<compile_context>
chip_gen: v5e
topology: v5e:2x2
jax: 0.10.0
libtpu: 0.0.40
codegen_flags: <defaults>
</compile_context>

<pallas_src>
import jax
import jax.numpy as jnp
from jax import lax
from jax.experimental import pallas as pl
from jax.experimental.pallas import tpu as pltpu


def _round_up(x: int, m: int) -> int:
    return ((x + m - 1) // m) * m


def _chip_info():
    """Best-effort chip kind + per-core VMEM capacity (bytes)."""
    kind = ""
    try:
        kind = jax.devices()[0].device_kind.lower()
    except Exception:
        pass
    vmem_cap = None
    try:
        vmem_cap = int(pltpu.get_tpu_info().vmem_capacity_bytes)
    except Exception:
        vmem_cap = None
    if vmem_cap is None:
        # v7x has 64 MiB / TensorCore, earlier generations 128 MiB.
        vmem_cap = (64 << 20) if "v7" in kind else (128 << 20)
    return kind, vmem_cap


# ---------------------------------------------------------------------------
# Kernels
# ---------------------------------------------------------------------------

def _fused_stack_kernel(x_ref, w_ref, b_ref, o_ref):
    """Fast path: all layers in one grid step (whole weight stack in VMEM).

    x_ref: (tm, D)        f32   input activations
    w_ref: (L, D, D)      bf16  weights, already (in, out) layout
    b_ref: (L, 1, D)      f32   biases
    o_ref: (tm, D)        f32   output
    """
    n_layers = w_ref.shape[0]

    def body(l, act):
        y = jnp.dot(
            act.astype(jnp.bfloat16),
            w_ref[l],
            preferred_element_type=jnp.float32,
        )
        return y + b_ref[l]

    act = lax.fori_loop(0, n_layers, body, x_ref[...], unroll=True)
    o_ref[...] = act


def _stacked_linear_kernel(x_ref, w_ref, b_ref, o_ref):
    """Streamed path: one grid step = one (batch_tile, layer) pair.

    The running activation lives in o_ref (its BlockSpec index ignores the
    layer axis, so the block stays resident across layers and is written back
    to HBM only once per batch tile).

    x_ref: (tm, D)     f32   input activations (consumed at layer 0 only)
    w_ref: (D, D)      bf16  this layer's weight, (in, out) layout
    b_ref: (L, 1, D)   f32   whole bias stack (resident, constant index_map)
    o_ref: (tm, D)     f32   activation carry / final output tile
    """
    l = pl.program_id(1)

    @pl.when(l == 0)
    def _init():
        o_ref[...] = x_ref[...]

    y = jnp.dot(
        o_ref[...].astype(jnp.bfloat16),
        w_ref[...],
        preferred_element_type=jnp.float32,
    )
    o_ref[...] = y + b_ref[l]


# ---------------------------------------------------------------------------
# Wrapper
# ---------------------------------------------------------------------------

def gpu_module_forward(x, weights, biases):
    """Forward pass of GpuModule (sequential stack of nn.Linear layers).

    x:       (B, D) float32
    weights: (L, D_out, D_in) float32   -- torch nn.Linear layout (out, in)
    biases:  (L, D_out) float32
    returns: (B, D_out) float32
    """
    L, d_out, d_in = weights.shape
    B, D = x.shape
    assert D == d_in, "input feature dim must match layer in_dim"
    # TODO(synk): non-square layers would need per-layer ragged blocking.
    assert d_in == d_out, "sequential Linear stack requires input_dim == output_dim"

    kind, vmem_cap = _chip_info()
    # Leave >=8 MiB headroom under the physical per-core VMEM; never request
    # more than ~110 MiB even on 128 MiB parts.
    vmem_ceiling = max(min(vmem_cap - (8 << 20), 110 << 20), 24 << 20)

    # Lane-dense / sublane-aligned padding.
    D_pad = _round_up(D, 128)
    w_blk = D_pad * D_pad * 2          # one bf16 weight block
    bias_bytes = L * D_pad * 4         # whole f32 bias stack

    # torch (out, in) -> (in, out) so the kernel contracts (1, 0): plain NN
    # matmul on the MXU with no per-tile transpose. Fused with bf16 cast + pad.
    w_p = jnp.transpose(weights.astype(jnp.bfloat16), (0, 2, 1))
    w_p = jnp.pad(w_p, ((0, 0), (0, D_pad - d_in), (0, D_pad - d_out)))
    b_p = jnp.pad(biases.astype(jnp.float32), ((0, 0), (0, D_pad - d_out)))
    b_p = b_p.reshape(L, 1, D_pad)

    # Fast path when the full (double-buffered) bf16 weight stack is a small
    # fraction of VMEM: drop the layer grid axis entirely.
    use_fast = (2 * L * w_blk) <= (vmem_ceiling // 4)

    # Batch-tile target per chip generation (rows needed to hide weight DMA
    # behind the matmul), then capped by what actually fits in VMEM.
    if "v7" in kind:
        tm_target = 512
    elif "v6" in kind:
        tm_target = 768
    else:                     # v5e / unknown
        tm_target = 384

    fixed = (2 * L * w_blk if use_fast else 2 * w_blk) + 2 * bias_bytes + (2 << 20)
    per_row = 16 * D_pad      # x (2 bufs) + o (2 bufs), f32, per batch row
    avail = vmem_ceiling - fixed
    tm_fit = max(8, (avail // per_row) // 8 * 8) if avail > per_row * 8 else 8
    tm = max(8, min(tm_target, tm_fit, _round_up(B, 8)))

    B_pad = _round_up(B, tm)
    nb = B_pad // tm

    x_p = jnp.pad(x.astype(jnp.float32), ((0, B_pad - B), (0, D_pad - D)))

    vmem_needed = fixed + 4 * tm * D_pad * 4
    vmem_limit = int(min(max(vmem_needed + (4 << 20), 32 << 20), vmem_ceiling))

    if use_fast:
        cost = pl.CostEstimate(
            flops=2 * B_pad * D_pad * D_pad * L,
            transcendentals=0,
            bytes_accessed=L * w_blk + bias_bytes + 2 * B_pad * D_pad * 4,
        )
        out = pl.pallas_call(
            _fused_stack_kernel,
            out_shape=jax.ShapeDtypeStruct((B_pad, D_pad), jnp.float32),
            grid_spec=pltpu.PrefetchScalarGridSpec(
                num_scalar_prefetch=0,
                grid=(nb,),
                in_specs=[
                    pl.BlockSpec((tm, D_pad), lambda i: (i, 0)),            # x tile
                    pl.BlockSpec((L, D_pad, D_pad), lambda i: (0, 0, 0)),   # all W
                    pl.BlockSpec((L, 1, D_pad), lambda i: (0, 0, 0)),       # all b
                ],
                out_specs=pl.BlockSpec((tm, D_pad), lambda i: (i, 0)),
            ),
            compiler_params=pltpu.CompilerParams(
                dimension_semantics=("parallel",),
                vmem_limit_bytes=vmem_limit,
            ),
            cost_estimate=cost,
        )(x_p, w_p, b_p)
    else:
        cost = pl.CostEstimate(
            flops=2 * B_pad * D_pad * D_pad * L,
            transcendentals=0,
            bytes_accessed=nb * L * w_blk + bias_bytes + 2 * B_pad * D_pad * 4,
        )
        out = pl.pallas_call(
            _stacked_linear_kernel,
            out_shape=jax.ShapeDtypeStruct((B_pad, D_pad), jnp.float32),
            grid_spec=pltpu.PrefetchScalarGridSpec(
                num_scalar_prefetch=0,
                grid=(nb, L),
                in_specs=[
                    pl.BlockSpec((tm, D_pad), lambda i, l: (i, 0)),              # x tile
                    pl.BlockSpec((None, D_pad, D_pad), lambda i, l: (l, 0, 0)),  # W[l]
                    pl.BlockSpec((L, 1, D_pad), lambda i, l: (0, 0, 0)),         # all b
                ],
                out_specs=pl.BlockSpec((tm, D_pad), lambda i, l: (i, 0)),
            ),
            compiler_params=pltpu.CompilerParams(
                dimension_semantics=("parallel", "arbitrary"),
                vmem_limit_bytes=vmem_limit,
            ),
            cost_estimate=cost,
        )(x_p, w_p, b_p)

    return out[:B, :d_out]


# ---------------------------------------------------------------------------
# Demo / self-test
# ---------------------------------------------------------------------------

def _init_params(key, n_layers, input_dim, output_dim):
    """Deterministic init matching torch.nn.Linear's default:
    U(-1/sqrt(in_dim), 1/sqrt(in_dim)) for both weight and bias."""
    bound = 1.0 / jnp.sqrt(jnp.float32(input_dim))
    kw, kb = jax.random.split(key)
    weights = jax.random.uniform(
        kw, (n_layers, output_dim, input_dim), jnp.float32, -bound, bound
    )
    biases = jax.random.uniform(
        kb, (n_layers, output_dim), jnp.float32, -bound, bound
    )
    return weights, biases


if __name__ == "__main__":
    # Small, lane-aligned shapes consistent with the module (stack of Linears).
    n_layers = 3
    dim = 128          # input_dim == output_dim, multiple of 128 (lane-dense)
    batch = 8

    key = jax.random.PRNGKey(0)
    kx, kp = jax.random.split(key)
    x = jax.random.normal(kx, (batch, dim), jnp.float32)
    weights, biases = _init_params(kp, n_layers, dim, dim)

    out = jax.block_until_ready(gpu_module_forward(x, weights, biases))
    assert out.shape == (batch, dim)

    # Pure-JAX reference following the same numeric path as the kernel
    # (bf16 operands on the MXU, f32 accumulation, f32 bias add).
    ref = x
    for l in range(n_layers):
        ref = (
            lax.dot_general(
                ref.astype(jnp.bfloat16),
                weights[l].astype(jnp.bfloat16),
                dimension_numbers=(((1,), (1,)), ((), ())),
                preferred_element_type=jnp.float32,
            )
            + biases[l]
        )
    assert jnp.allclose(out, ref, atol=5e-3, rtol=5e-3), "mismatch vs reference"

    print("KERNEL_OK")
</pallas_src>

<mosaic_0001>
module attributes {stable_mosaic.version = 11 : i64} {
  func.func @_fused_stack_kernel(%arg0: i32, %arg1: memref<8x128xf32, #tpu.memory_space<vmem>>, %arg2: memref<3x128x128xbf16, #tpu.memory_space<vmem>>, %arg3: memref<3x1x128xf32, #tpu.memory_space<vmem>>, %arg4: memref<8x128xf32, #tpu.memory_space<vmem>>) attributes {dimension_semantics = [#tpu.dimension_semantics<parallel>], iteration_bounds = array<i64: 1>, scalar_prefetch = 0 : i64, scratch_operands = 0 : i64, tpu.core_type = #tpu.core_type<tc>, window_params = [{transform_indices = @transform_0, window_bounds = array<i64: 8, 128>}, {pipeline_mode = #tpu.pipeline_mode<synchronous>, transform_indices = @transform_1, window_bounds = array<i64: 3, 128, 128>}, {pipeline_mode = #tpu.pipeline_mode<synchronous>, transform_indices = @transform_2, window_bounds = array<i64: 3, 1, 128>}, {transform_indices = @transform_3, window_bounds = array<i64: 8, 128>}]} {
    %c0 = arith.constant 0 : index
    %c0_0 = arith.constant 0 : index
    %0 = vector.load %arg1[%c0, %c0_0] : memref<8x128xf32, #tpu.memory_space<vmem>>, vector<8x128xf32>
    %c0_i32 = arith.constant 0 : i32
    %1 = arith.truncf %0 : vector<8x128xf32> to vector<8x128xbf16>
    %2 = arith.index_cast %c0_i32 : i32 to index
    %c0_1 = arith.constant 0 : index
    %c0_2 = arith.constant 0 : index
    %3 = vector.load %arg2[%2, %c0_1, %c0_2] : memref<3x128x128xbf16, #tpu.memory_space<vmem>>, vector<1x128x128xbf16>
    %4 = vector.shape_cast %3 : vector<1x128x128xbf16> to vector<128x128xbf16>
    %cst = arith.constant dense<0.000000e+00> : vector<8x128xf32>
    %5 = tpu.matmul %1, %4, %cst {dimension_numbers = #tpu.dot_dimension_numbers<[1], [0], [0], [1], [0, 0, 1, 1], [], []>} : vector<8x128xbf16>, vector<128x128xbf16>, vector<8x128xf32> -> vector<8x128xf32>
    %6 = arith.index_cast %c0_i32 : i32 to index
    %c0_3 = arith.constant 0 : index
    %c0_4 = arith.constant 0 : index
    %7 = vector.load %arg3[%6, %c0_3, %c0_4] : memref<3x1x128xf32, #tpu.memory_space<vmem>>, vector<1x1x128xf32>
    %8 = vector.shape_cast %7 : vector<1x1x128xf32> to vector<1x128xf32>
    %9 = vector.broadcast %8 : vector<1x128xf32> to vector<8x128xf32>
    %10 = arith.addf %5, %9 : vector<8x128xf32>
    %c1_i32 = arith.constant 1 : i32
    %11 = arith.truncf %10 : vector<8x128xf32> to vector<8x128xbf16>
    %12 = arith.index_cast %c1_i32 : i32 to index
    %c0_5 = arith.constant 0 : index
    %c0_6 = arith.constant 0 : index
    %13 = vector.load %arg2[%12, %c0_5, %c0_6] : memref<3x128x128xbf16, #tpu.memory_space<vmem>>, vector<1x128x128xbf16>
    %14 = vector.shape_cast %13 : vector<1x128x128xbf16> to vector<128x128xbf16>
    %cst_7 = arith.constant dense<0.000000e+00> : vector<8x128xf32>
    %15 = tpu.matmul %11, %14, %cst_7 {dimension_numbers = #tpu.dot_dimension_numbers<[1], [0], [0], [1], [0, 0, 1, 1], [], []>} : vector<8x128xbf16>, vector<128x128xbf16>, vector<8x128xf32> -> vector<8x128xf32>
    %16 = arith.index_cast %c1_i32 : i32 to index
    %c0_8 = arith.constant 0 : index
    %c0_9 = arith.constant 0 : index
    %17 = vector.load %arg3[%16, %c0_8, %c0_9] : memref<3x1x128xf32, #tpu.memory_space<vmem>>, vector<1x1x128xf32>
    %18 = vector.shape_cast %17 : vector<1x1x128xf32> to vector<1x128xf32>
    %19 = vector.broadcast %18 : vector<1x128xf32> to vector<8x128xf32>
    %20 = arith.addf %15, %19 : vector<8x128xf32>
    %c2_i32 = arith.constant 2 : i32
    %21 = arith.truncf %20 : vector<8x128xf32> to vector<8x128xbf16>
    %22 = arith.index_cast %c2_i32 : i32 to index
    %c0_10 = arith.constant 0 : index
    %c0_11 = arith.constant 0 : index
    %23 = vector.load %arg2[%22, %c0_10, %c0_11] : memref<3x128x128xbf16, #tpu.memory_space<vmem>>, vector<1x128x128xbf16>
    %24 = vector.shape_cast %23 : vector<1x128x128xbf16> to vector<128x128xbf16>
    %cst_12 = arith.constant dense<0.000000e+00> : vector<8x128xf32>
    %25 = tpu.matmul %21, %24, %cst_12 {dimension_numbers = #tpu.dot_dimension_numbers<[1], [0], [0], [1], [0, 0, 1, 1], [], []>} : vector<8x128xbf16>, vector<128x128xbf16>, vector<8x128xf32> -> vector<8x128xf32>
    %26 = arith.index_cast %c2_i32 : i32 to index
    %c0_13 = arith.constant 0 : index
    %c0_14 = arith.constant 0 : index
    %27 = vector.load %arg3[%26, %c0_13, %c0_14] : memref<3x1x128xf32, #tpu.memory_space<vmem>>, vector<1x1x128xf32>
    %28 = vector.shape_cast %27 : vector<1x1x128xf32> to vector<1x128xf32>
    %29 = vector.broadcast %28 : vector<1x128xf32> to vector<8x128xf32>
    %30 = arith.addf %25, %29 : vector<8x128xf32>
    %c3_i32 = arith.constant 3 : i32
    %c0_15 = arith.constant 0 : index
    %c0_16 = arith.constant 0 : index
    %31 = vector.load %arg4[%c0_15, %c0_16] : memref<8x128xf32, #tpu.memory_space<vmem>>, vector<8x128xf32>
    tpu.vector_store %arg4[%c0_15, %c0_16], %30 {strides = array<i32>} : memref<8x128xf32, #tpu.memory_space<vmem>>, vector<8x128xf32>,
    return
  }
  func.func @transform_0(%arg0: i32) -> (i32, i32) {
    %c0_i32 = arith.constant 0 : i32
    %c0_i32_0 = arith.constant 0 : i32
    return %arg0, %c0_i32 : i32, i32
  }
  func.func @transform_1(%arg0: i32) -> (i32, i32, i32) {
    %c0_i32 = arith.constant 0 : i32
    %c0_i32_0 = arith.constant 0 : i32
    %c0_i32_1 = arith.constant 0 : i32
    %c0_i32_2 = arith.constant 0 : i32
    return %c0_i32, %c0_i32_0, %c0_i32_1 : i32, i32, i32
  }
  func.func @transform_2(%arg0: i32) -> (i32, i32, i32) {
    %c0_i32 = arith.constant 0 : i32
    %c0_i32_0 = arith.constant 0 : i32
    %c0_i32_1 = arith.constant 0 : i32
    %c0_i32_2 = arith.constant 0 : i32
    return %c0_i32, %c0_i32_0, %c0_i32_1 : i32, i32, i32
  }
  func.func @transform_3(%arg0: i32) -> (i32, i32) {
    %c0_i32 = arith.constant 0 : i32
    %c0_i32_0 = arith.constant 0 : i32
    return %arg0, %c0_i32 : i32, i32
  }
}

</mosaic_0001>

<bundles_post_ra>
// kernel: tpu_custom_call.1
= control target key start
LH: loop header
LB: loop body
LE: loop exit
PB: predicated region body
PF: predicated region fallthrough
CT: control target
= control target key end

     0   :  { %8 = vsyncpa [#allocation3], 0  ;;  %s603_s0 = inlined_call_operand.hbm [shape: f32[8,128], index: 0, kind: input, shape index: {}]   ;;  %s604_s1 = inlined_call_operand.hbm [shape: bf16[3,128,128], index: 1, kind: input, shape index: {}]   ;;  %s605_s2 = inlined_call_operand.hbm [shape: f32[3,1,128], index: 2, kind: input, shape index: {}]   ;;  %s606_s3 = inlined_call_operand.hbm [shape: f32[8,128], index: 3, kind: output, shape index: {}]  }
   0x1   :  { %9 = vsyncpa [#allocation6], 0  ;;  %s26_s14 = sshll.u32 %s604_s1, 4  ;;  %s27_s14 = int_to_ptr.hbm [resolvable:$true] %s26_s14 }
   0x2   :  { %10 = vsyncpa [#allocation4], 0  ;;  %s563_s15 = smov [#allocation5]   ;;  %s16_s19 = sshll.u32 %s603_s0, 4  ;;  %s17_s19 = int_to_ptr.hbm [resolvable:$true] %s16_s19 }
   0x3   :  { %s28_s16 = sshll.u32 %s563_s15, 4  ;;  %s564_s20 = smov 64   ;;  %s29_s16 = int_to_ptr.vmem [resolvable:$true] %s28_s16 }
   0x4   :  { %s565_s21 = smov 4   ;;  %s566_s22 = smov [#allocation2]  }
   0x5   :  { %34 = dma.hbm_to_vmem [thread:$0]  %s27_s14, 3072, %s29_s16, [#allocation6], %s564_s20, %s564_s20, %s565_s21  }
   0x6   :  { %s18_s23 = sshll.u32 %s566_s22, 4  ;;  %s39_s26 = sshll.u32 %s605_s2, 4  ;;  %s19_s23 = int_to_ptr.vmem [resolvable:$true] %s18_s23  ;;  %s40_s26 = int_to_ptr.hbm [resolvable:$true] %s39_s26 }
   0x7   :  { %21 = dma.hbm_to_vmem [thread:$0]  %s17_s19, 128, %s19_s23, [#allocation3]  }
   0x8   :  { %s567_s1 = smov [#allocation7]   ;;  %s568_s28 = smov 16  }
   0x9   :  { %s41_s27 = sshll.u32 %s567_s1, 4  ;;  %s569_s29 = smov 1   ;;  %s42_s27 = int_to_ptr.vmem [resolvable:$true] %s41_s27 }
   0xa   :  { %47 = dma.hbm_to_vmem [thread:$0]  %s40_s26, 48, %s42_s27, [#allocation6], %s568_s28, %s568_s28, %s569_s29  }
   0xb   :  { %557 = dma.done.wait [#allocation3], 128  }
   0xc   :  { %558 = vsyncadd [#allocation3], 4294967168 }
   0xd   :  { %559 = dma.done.wait [#allocation6], 3120  }
   0xe   :  { %560 = vsyncadd [#allocation6], 4294964176  ;;  %v433_v0 = vld [vmem:[#allocation5 + $0x38] sm:$0xff]  ;;  %v432_v1 = vld [vmem:[#allocation5 + $0x30] sm:$0xff]  ;;  %s570_s0 = smov [#allocation8]   ;;  %s319_s5 = sshll.u32 %s606_s3, 4  ;;  %s320_s5 = int_to_ptr.hbm [resolvable:$true] %s319_s5 }
   0xf   :  { %130 = vmatpush.bf16.msra.mxu0 %v433_v0  ;;  %v441_v2 = vld [vmem:[#allocation5 + $0x78] sm:$0xff]  ;;  %v440_v3 = vld [vmem:[#allocation5 + $0x70] sm:$0xff]  ;;  %v431_v4 = vld [vmem:[#allocation5 + $0x28] sm:$0xff]  ;;  %s317_s2 = sshll.u32 %s570_s0, 4  ;;  %s318_s2 = int_to_ptr.vmem [resolvable:$true] %s317_s2 }
  0x10   :  { %214 = vmatpush.bf16.msra.mxu1 %v441_v2  ;;  %v439_v5 = vld [vmem:[#allocation5 + $0x68] sm:$0xff]  ;;  %v430_v6 = vld [vmem:[#allocation5 + $0x20] sm:$0xff]  ;;  %v429_v8 = vld [vmem:[#allocation5 + $0x18] sm:$0xff] }
  0x11   :  { %v438_v7 = vld [vmem:[#allocation5 + $0x60] sm:$0xff]  ;;  %v437_v9 = vld [vmem:[#allocation5 + $0x58] sm:$0xff]  ;;  %v428_v10 = vld [vmem:[#allocation5 + $0x10] sm:$0xff] }
  0x12   :  { %v436_v11 = vld [vmem:[#allocation5 + $0x50] sm:$0xff]  ;;  %v427_v12 = vld [vmem:[#allocation5 + $0x8] sm:$0xff]  ;;  %v426_v14 = vld [vmem:[#allocation5] sm:$0xff] }
  0x13   :  { %131 = vmatpush.bf16.msra.mxu0 %v432_v1  ;;  %v435_v13 = vld [vmem:[#allocation5 + $0x48] sm:$0xff]  ;;  %v60_v15 = vld [vmem:[#allocation2] sm:$0xff]  ;;  %v434_v17 = vld [vmem:[#allocation5 + $0x40] sm:$0xff] }
  0x14   :  { %215 = vmatpush.bf16.msra.mxu1 %v440_v3  ;;  %v61_v16 = vpack.c.bf16 %v60_v15, %v60_v15  ;;  %v449_v18 = vld [vmem:[#allocation5 + $0xb8] sm:$0xff]  ;;  %v448_v19 = vld [vmem:[#allocation5 + $0xb0] sm:$0xff]  ;;  %v447_v20 = vld [vmem:[#allocation5 + $0xa8] sm:$0xff] }
  0x15   :  { %298 = vmatpush.bf16.msra.mxu2 %v449_v18  ;;  %v446_v21 = vld [vmem:[#allocation5 + $0xa0] sm:$0xff]  ;;  %v445_v22 = vld [vmem:[#allocation5 + $0x98] sm:$0xff]  ;;  %v444_v23 = vld [vmem:[#allocation5 + $0x90] sm:$0xff] }
  0x16   :  { %v458_v24 = vld [vmem:[#allocation7] ss:$0 sm:$0xff]  ;;  %v443_v25 = vld [vmem:[#allocation5 + $0x88] sm:$0xff]  ;;  %v459_v31 = vld [vmem:[#allocation7 + $0x1] ss:$0 sm:$0xff] }
  0x17   :  { %132 = vmatpush.bf16.msra.mxu0 %v431_v4  ;;  %v442_v30 = vld [vmem:[#allocation5 + $0x80] sm:$0xff] }
  0x18   :  { %216 = vmatpush.bf16.msra.mxu1 %v439_v5  ;;  %v460_v36 = vld [vmem:[#allocation7 + $0x2] ss:$0 sm:$0xff] }
  0x19   :  { %299 = vmatpush.bf16.msra.mxu2 %v448_v19 }
  0x1b   :  { %133 = vmatpush.bf16.msra.mxu0 %v430_v6 }
  0x1c   :  { %217 = vmatpush.bf16.msra.mxu1 %v438_v7 }
  0x1d   :  { %300 = vmatpush.bf16.msra.mxu2 %v447_v20 }
  0x1f   :  { %134 = vmatpush.bf16.msra.mxu0 %v429_v8 }
  0x20   :  { %218 = vmatpush.bf16.msra.mxu1 %v437_v9 }
  0x21   :  { %301 = vmatpush.bf16.msra.mxu2 %v446_v21 }
  0x23   :  { %135 = vmatpush.bf16.msra.mxu0 %v428_v10 }
  0x24   :  { %219 = vmatpush.bf16.msra.mxu1 %v436_v11 }
  0x25   :  { %302 = vmatpush.bf16.msra.mxu2 %v445_v22 }
  0x27   :  { %136 = vmatpush.bf16.msra.mxu0 %v427_v12 }
  0x28   :  { %220 = vmatpush.bf16.msra.mxu1 %v435_v13 }
  0x29   :  { %303 = vmatpush.bf16.msra.mxu2 %v444_v23 }
  0x2b   :  { %137 = vmatpush.bf16.msra.mxu0 %v426_v14 }
  0x2c   :  { %221 = vmatpush.bf16.msra.mxu1 %v434_v17 }
  0x2d   :  { %304 = vmatpush.bf16.msra.mxu2 %v443_v25 }
  0x2e   :  { %138 = vmatmul.bf16.vlgmr.msra.gmra.mxu0 %v61_v16 }
  0x31   :  { %305 = vmatpush.bf16.msra.mxu2 %v442_v30 }
  0xab   :  { %v139_v26 = vpop.f32.mrf.mxu0 }
  0xac   :  { %v140_v27 = vadd.f32 %v458_v24, %v139_v26 }
  0xae   :  { %v143_v28 = vpack.c.bf16 %v140_v27, %v140_v27 }
  0xb0   :  { %222 = vmatmul.bf16.vlgmr.msra.gmra.mxu1 %v143_v28 }
  0xb3   :  { %v141_v29 = vpop.f32.mrf.mxu0 }
 0x12d   :  { %v223_v32 = vpop.f32.mrf.mxu1 }
 0x12e   :  { %v224_v33 = vadd.f32 %v459_v31, %v223_v32 }
 0x130   :  { %v227_v34 = vpack.c.bf16 %v224_v33, %v224_v33 }
 0x132   :  { %306 = vmatmul.bf16.vlgmr.msra.gmra.mxu2 %v227_v34 }
 0x135   :  { %v225_v35 = vpop.f32.mrf.mxu1 }
 0x1b5   :  { %v307_v37 = vpop.f32.mrf.mxu2 }
 0x1b6   :  { %v308_v38 = vadd.f32 %v460_v36, %v307_v37 }
 0x1b8   :  { %311 = vst [vmem:[#allocation8] sm:$0xff] %v308_v38 }
 0x1b9   :  { %322 = dma.vmem_to_hbm [thread:$0]  %s318_s2, 128, %s320_s5, [#allocation4]  }
 0x1bd   :  { %v309_v39 = vpop.f32.mrf.mxu2 }
 0x1be   :  { %561 = dma.done.wait [#allocation4], 128  }
 0x1bf   :  { %562 = vsyncadd [#allocation4], 4294967168 }
 0x1c0   :  { %327 = vsyncpa [#allocation3], 1 }
 0x1c1   :  { %328 = vsyncpa [#allocation6], 1 }
 0x1c2   :  { %329 = vsyncpa [#allocation4], 1 }

</bundles_post_ra>
